<compile_context>
chip_gen: v6e
topology: v6e:2x2x1
jax: 0.10.0
libtpu: 0.0.40
codegen_flags: <defaults>
</compile_context>

<pallas_src>
import functools

import jax
import jax.numpy as jnp
from jax.experimental import pallas as pl
from jax.experimental.pallas import tpu as pltpu

EPS = 1e-8          # BatchNorm1d eps used by Dice
LANE = 128          # pad the hidden (channel) axis to a full lane width


def _pick_tile_t(T, max_tile=512):
    """Row tile along T: full T if small, else a multiple-of-8 divisor."""
    if T <= max_tile:
        return T
    for cand in range(max_tile, 7, -1):
        if T % cand == 0 and cand % 8 == 0:
            return cand
    return T  # fallback: single tile (only hit for pathological T)


def _lau_kernel(ub_ref, qproj_ref, weff_ref,
                alpha_ref, gamma_ref, beta_ref,
                w23_ref, b23_ref,
                out_ref,
                sum_ref, sq_ref,
                *, inv_n):
    phase = pl.program_id(0)
    b = pl.program_id(1)
    tt = pl.program_id(2)

    # fc1 first linear for this (batch, T-tile), concat folded away:
    #   h = q_proj[b] + ub @ (W_ub_eff + q[b] ⊙ W_prod)        -> [tile_T, 128]
    h = jnp.dot(ub_ref[0], weff_ref[0],
                preferred_element_type=jnp.float32) + qproj_ref[0]

    @pl.when((phase == 0) & (b == 0) & (tt == 0))
    def _init():
        sum_ref[...] = jnp.zeros_like(sum_ref)
        sq_ref[...] = jnp.zeros_like(sq_ref)

    @pl.when(phase == 0)
    def _accumulate_stats():
        # Global (all N = B*T rows) per-channel moments for train-mode BN.
        sum_ref[...] += jnp.sum(h, axis=0, keepdims=True)
        sq_ref[...] += jnp.sum(h * h, axis=0, keepdims=True)

    @pl.when(phase == 1)
    def _apply():
        @pl.when((b == 0) & (tt == 0))
        def _finalize_stats():
            mean = sum_ref[...] * inv_n
            var = jnp.maximum(sq_ref[...] * inv_n - mean * mean, 0.0)
            scale = gamma_ref[...] * jax.lax.rsqrt(var + EPS)
            shift = beta_ref[...] - mean * scale
            sum_ref[...] = scale      # scratch reused: now holds BN scale
            sq_ref[...] = shift       # scratch reused: now holds BN shift

        # Dice: sigmoid(BN(h)) gate mixing identity and alpha branches.
        x_p = jax.nn.sigmoid(h * sum_ref[...] + sq_ref[...])
        h_d = (alpha_ref[...] * (1.0 - x_p) + x_p) * h            # [tile_T, 128]

        # Folded Linear(128, 1): contract the channel axis; the NT matmul
        # yields a (1, tile_T) lane-dense score row directly.
        scores = jax.lax.dot_general(
            w23_ref[...], h_d, (((1,), (1,)), ((), ())),
            preferred_element_type=jnp.float32)                   # [1, tile_T]
        scores = scores + b23_ref[0, 0]
        out_ref[:, pl.ds(tt, 1), :] = scores.reshape(1, 1, -1)


def local_activation_unit(query, user_behavior, params, max_tile=512):
    """query: [B, 1, E], user_behavior: [B, T, E] -> scores [B, T, 1]."""
    B, T, E = user_behavior.shape
    assert query.shape == (B, 1, E)
    tile_t = _pick_tile_t(T, max_tile)
    n_t = T // tile_t
    assert n_t * tile_t == T
    n_rows = B * T

    w1, b1 = params["w1"], params["b1"]          # [4E, H1], [1, H1]
    w2, _b2 = params["w2"], params["b2"]         # [H1, H2], [1, H2]
    w3, _b3 = params["w3"], params["b3"]         # [H2, 1],  [1, 1]

    h1 = w1.shape[1]
    h1p = ((h1 + LANE - 1) // LANE) * LANE
    pad = h1p - h1

    def pad_cols(a, value=0.0):
        return jnp.pad(a, ((0, 0), (0, pad)), constant_values=value)

    # Split w1 into its four E-row blocks and fold the concat away:
    #   [q, ub, q-ub, q*ub] @ w1 = q@(A+C) + ub@(B-C) + (q*ub)@D
    w_q = pad_cols(w1[:E] + w1[2 * E:3 * E])            # [E, H1P]
    w_ub = pad_cols(w1[E:2 * E] - w1[2 * E:3 * E])      # [E, H1P]
    w_pr = pad_cols(w1[3 * E:])                          # [E, H1P]
    b1p = pad_cols(b1)                                   # [1, H1P]

    alpha = pad_cols(params["alpha"])                    # [1, H1P]
    gamma = pad_cols(params["gamma"], 1.0)
    beta = pad_cols(params["beta"])

    q2d = query[:, 0, :]                                              # [B, E]
    # Query-dependent half of fc1, computed B times (not B*T times), + bias.
    q_proj = (q2d @ w_q + b1p).reshape(B, 1, h1p)                     # [B,1,H1P]
    # Per-batch effective behavior weight folds the (q*ub) term in.
    w_eff = w_ub[None] + q2d[:, :, None] * w_pr[None]                 # [B,E,H1P]

    # Fold Linear(H1,H2) + Linear(H2,1) (no nonlinearity in between).
    w23 = pad_cols((w2 @ w3).T)                                       # [1, H1P]
    b23 = (_b2 @ w3 + _b3).astype(jnp.float32)                        # [1, 1]

    kernel = functools.partial(_lau_kernel, inv_n=1.0 / float(n_rows))

    param_spec = pl.BlockSpec((1, h1p), lambda p, b, t: (0, 0))       # resident
    out = pl.pallas_call(
        kernel,
        out_shape=jax.ShapeDtypeStruct((B, n_t, tile_t), jnp.float32),
        grid_spec=pltpu.PrefetchScalarGridSpec(
            num_scalar_prefetch=0,
            grid=(2, B, n_t),          # (BN-stats phase, batch, T tiles)
            in_specs=[
                pl.BlockSpec((1, tile_t, E), lambda p, b, t: (b, t, 0)),
                pl.BlockSpec((1, 1, h1p), lambda p, b, t: (b, 0, 0)),
                pl.BlockSpec((1, E, h1p), lambda p, b, t: (b, 0, 0)),
                param_spec,            # alpha
                param_spec,            # gamma
                param_spec,            # beta
                param_spec,            # folded W23 row
                pl.BlockSpec((1, 1), lambda p, b, t: (0, 0),
                             memory_space=pltpu.MemorySpace.SMEM),    # b23
            ],
            out_specs=pl.BlockSpec((1, n_t, tile_t), lambda p, b, t: (b, 0, 0)),
            scratch_shapes=[pltpu.VMEM((1, h1p), jnp.float32),
                            pltpu.VMEM((1, h1p), jnp.float32)],
        ),
        compiler_params=pltpu.CompilerParams(
            # Global train-mode BN stats couple every grid step, so all axes
            # must stay sequential (phase 0 fully before phase 1).
            dimension_semantics=("arbitrary", "arbitrary", "arbitrary")),
    )(user_behavior, q_proj, w_eff, alpha, gamma, beta, w23, b23)

    return out.reshape(B, T, 1)


def init_params(key, embedding_dim=4, hidden_unit=(80, 40)):
    """Deterministic parameter init (torch-Linear-style uniform bounds)."""
    in0 = 4 * embedding_dim
    h1, h2 = hidden_unit
    ks = jax.random.split(key, 8)

    def lin(kw, kb, fan_in, fan_out):
        bound = 1.0 / jnp.sqrt(fan_in)
        w = jax.random.uniform(kw, (fan_in, fan_out), jnp.float32, -bound, bound)
        b = jax.random.uniform(kb, (1, fan_out), jnp.float32, -bound, bound)
        return w, b

    w1, b1 = lin(ks[0], ks[1], in0, h1)
    w2, b2 = lin(ks[2], ks[3], h1, h2)
    w3, b3 = lin(ks[4], ks[5], h2, 1)
    # Torch inits Dice alpha to zeros; use small random values here so the
    # alpha branch of the kernel is actually exercised.
    alpha = 0.1 * jax.random.normal(ks[6], (1, h1), jnp.float32)
    gamma = jnp.ones((1, h1), jnp.float32)   # BatchNorm1d weight
    beta = jnp.zeros((1, h1), jnp.float32)   # BatchNorm1d bias
    return dict(w1=w1, b1=b1, w2=w2, b2=b2, w3=w3, b3=b3,
                alpha=alpha, gamma=gamma, beta=beta)


def _reference(query, user_behavior, p):
    """Pure-JAX reference mirroring the PyTorch forward (train-mode BN)."""
    B, T, E = user_behavior.shape
    q = jnp.broadcast_to(query, (B, T, E))
    ub = user_behavior
    x = jnp.concatenate([q, ub, q - ub, q * ub], axis=-1).reshape(B * T, 4 * E)
    h = x @ p["w1"] + p["b1"]
    mean = jnp.mean(h, axis=0, keepdims=True)
    var = jnp.mean((h - mean) ** 2, axis=0, keepdims=True)
    x_p = jax.nn.sigmoid(p["gamma"] * (h - mean) / jnp.sqrt(var + EPS) + p["beta"])
    h = p["alpha"] * (1 - x_p) * h + x_p * h
    h2 = h @ p["w2"] + p["b2"]
    out = h2 @ p["w3"] + p["b3"]
    return out.reshape(B, T, 1)


if __name__ == "__main__":
    B, T, E = 2, 8, 4                     # embedding_dim=4 (module default)
    key = jax.random.PRNGKey(0)
    k_q, k_ub, k_p = jax.random.split(key, 3)
    query = jax.random.normal(k_q, (B, 1, E), jnp.float32)
    user_behavior = jax.random.normal(k_ub, (B, T, E), jnp.float32)
    params = init_params(k_p, embedding_dim=E, hidden_unit=(80, 40))

    scores = local_activation_unit(query, user_behavior, params)
    scores = jax.block_until_ready(scores)

    ref = _reference(query, user_behavior, params)
    assert scores.shape == (B, T, 1)
    err = float(jnp.max(jnp.abs(scores - ref)))
    assert jnp.allclose(scores, ref, atol=1e-5, rtol=1e-5), err
    print("KERNEL_OK")
</pallas_src>

<mosaic_0001>
module attributes {stable_mosaic.version = 11 : i64} {
  func.func @_lau_kernel(%arg0: i32, %arg1: i32, %arg2: i32, %arg3: memref<1x8x4xf32, #tpu.memory_space<vmem>>, %arg4: memref<1x1x128xf32, #tpu.memory_space<vmem>>, %arg5: memref<1x4x128xf32, #tpu.memory_space<vmem>>, %arg6: memref<1x128xf32, #tpu.memory_space<vmem>>, %arg7: memref<1x128xf32, #tpu.memory_space<vmem>>, %arg8: memref<1x128xf32, #tpu.memory_space<vmem>>, %arg9: memref<1x128xf32, #tpu.memory_space<vmem>>, %arg10: memref<1x1xf32, #tpu.memory_space<smem>>, %arg11: memref<1x1x8xf32, #tpu.memory_space<vmem>>, %arg12: memref<1x128xf32, #tpu.memory_space<vmem>>, %arg13: memref<1x128xf32, #tpu.memory_space<vmem>>) attributes {dimension_semantics = [#tpu.dimension_semantics<arbitrary>, #tpu.dimension_semantics<arbitrary>, #tpu.dimension_semantics<arbitrary>], iteration_bounds = array<i64: 2, 2, 1>, scalar_prefetch = 0 : i64, scratch_operands = 2 : i64, tpu.core_type = #tpu.core_type<tc>, window_params = [{transform_indices = @transform_0, window_bounds = array<i64: 1, 8, 4>}, {transform_indices = @transform_1, window_bounds = array<i64: 1, 1, 128>}, {transform_indices = @transform_2, window_bounds = array<i64: 1, 4, 128>}, {pipeline_mode = #tpu.pipeline_mode<synchronous>, transform_indices = @transform_3, window_bounds = array<i64: 1, 128>}, {pipeline_mode = #tpu.pipeline_mode<synchronous>, transform_indices = @transform_4, window_bounds = array<i64: 1, 128>}, {pipeline_mode = #tpu.pipeline_mode<synchronous>, transform_indices = @transform_5, window_bounds = array<i64: 1, 128>}, {pipeline_mode = #tpu.pipeline_mode<synchronous>, transform_indices = @transform_6, window_bounds = array<i64: 1, 128>}, {transform_indices = @transform_7, window_bounds = array<i64: 1, 1>}, {transform_indices = @transform_8, window_bounds = array<i64: 1, 1, 8>}]} {
    %c0 = arith.constant 0 : index
    %c0_0 = arith.constant 0 : index
    %c0_1 = arith.constant 0 : index
    %0 = vector.load %arg3[%c0, %c0_0, %c0_1] : memref<1x8x4xf32, #tpu.memory_space<vmem>>, vector<1x8x4xf32>
    %1 = vector.shape_cast %0 : vector<1x8x4xf32> to vector<8x4xf32>
    %c0_2 = arith.constant 0 : index
    %c0_3 = arith.constant 0 : index
    %c0_4 = arith.constant 0 : index
    %2 = vector.load %arg5[%c0_2, %c0_3, %c0_4] : memref<1x4x128xf32, #tpu.memory_space<vmem>>, vector<1x4x128xf32>
    %3 = vector.shape_cast %2 : vector<1x4x128xf32> to vector<4x128xf32>
    %cst = arith.constant dense<0.000000e+00> : vector<8x128xf32>
    %4 = tpu.matmul %1, %3, %cst {dimension_numbers = #tpu.dot_dimension_numbers<[1], [0], [0], [1], [0, 0, 1, 1], [], []>} : vector<8x4xf32>, vector<4x128xf32>, vector<8x128xf32> -> vector<8x128xf32>
    %c0_5 = arith.constant 0 : index
    %c0_6 = arith.constant 0 : index
    %c0_7 = arith.constant 0 : index
    %5 = vector.load %arg4[%c0_5, %c0_6, %c0_7] : memref<1x1x128xf32, #tpu.memory_space<vmem>>, vector<1x1x128xf32>
    %6 = vector.shape_cast %5 : vector<1x1x128xf32> to vector<1x128xf32>
    %7 = vector.broadcast %6 : vector<1x128xf32> to vector<8x128xf32>
    %8 = arith.addf %4, %7 : vector<8x128xf32>
    %c0_i32 = arith.constant 0 : i32
    %9 = arith.cmpi eq, %arg0, %c0_i32 : i32
    %c0_i32_8 = arith.constant 0 : i32
    %10 = arith.cmpi eq, %arg1, %c0_i32_8 : i32
    %11 = arith.andi %9, %10 : i1
    %c0_i32_9 = arith.constant 0 : i32
    %12 = arith.cmpi eq, %arg2, %c0_i32_9 : i32
    %13 = arith.andi %11, %12 : i1
    %14 = arith.extui %13 : i1 to i32
    %c0_i32_10 = arith.constant 0 : i32
    %15 = arith.cmpi ne, %14, %c0_i32_10 : i32
    scf.if %15 {
      %cst_14 = arith.constant 0.000000e+00 : f32
      %22 = vector.broadcast %cst_14 : f32 to vector<1x128xf32>
      %c0_15 = arith.constant 0 : index
      %c0_16 = arith.constant 0 : index
      %23 = vector.load %arg12[%c0_15, %c0_16] : memref<1x128xf32, #tpu.memory_space<vmem>>, vector<1x128xf32>
      tpu.vector_store %arg12[%c0_15, %c0_16], %22 {strides = array<i32>} : memref<1x128xf32, #tpu.memory_space<vmem>>, vector<1x128xf32>,
      %cst_17 = arith.constant 0.000000e+00 : f32
      %24 = vector.broadcast %cst_17 : f32 to vector<1x128xf32>
      %c0_18 = arith.constant 0 : index
      %c0_19 = arith.constant 0 : index
      %25 = vector.load %arg13[%c0_18, %c0_19] : memref<1x128xf32, #tpu.memory_space<vmem>>, vector<1x128xf32>
      tpu.vector_store %arg13[%c0_18, %c0_19], %24 {strides = array<i32>} : memref<1x128xf32, #tpu.memory_space<vmem>>, vector<1x128xf32>,
    } else {
    }
    %c0_i32_11 = arith.constant 0 : i32
    %16 = arith.cmpi eq, %arg0, %c0_i32_11 : i32
    %17 = arith.extui %16 : i1 to i32
    %c0_i32_12 = arith.constant 0 : i32
    %18 = arith.cmpi ne, %17, %c0_i32_12 : i32
    scf.if %18 {
      %c0_14 = arith.constant 0 : index
      %c0_15 = arith.constant 0 : index
      %22 = vector.load %arg12[%c0_14, %c0_15] : memref<1x128xf32, #tpu.memory_space<vmem>>, vector<1x128xf32>
      %cst_16 = arith.constant dense<0.000000e+00> : vector<128xf32>
      %23 = vector.multi_reduction <add>, %8, %cst_16 [0] : vector<8x128xf32> to vector<128xf32>
      %24 = vector.shape_cast %23 : vector<128xf32> to vector<1x128xf32>
      %25 = arith.addf %22, %24 : vector<1x128xf32>
      %c0_17 = arith.constant 0 : index
      %c0_18 = arith.constant 0 : index
      %26 = vector.load %arg12[%c0_17, %c0_18] : memref<1x128xf32, #tpu.memory_space<vmem>>, vector<1x128xf32>
      tpu.vector_store %arg12[%c0_17, %c0_18], %25 {strides = array<i32>} : memref<1x128xf32, #tpu.memory_space<vmem>>, vector<1x128xf32>,
      %c0_19 = arith.constant 0 : index
      %c0_20 = arith.constant 0 : index
      %27 = vector.load %arg13[%c0_19, %c0_20] : memref<1x128xf32, #tpu.memory_space<vmem>>, vector<1x128xf32>
      %28 = arith.mulf %8, %8 : vector<8x128xf32>
      %cst_21 = arith.constant dense<0.000000e+00> : vector<128xf32>
      %29 = vector.multi_reduction <add>, %28, %cst_21 [0] : vector<8x128xf32> to vector<128xf32>
      %30 = vector.shape_cast %29 : vector<128xf32> to vector<1x128xf32>
      %31 = arith.addf %27, %30 : vector<1x128xf32>
      %c0_22 = arith.constant 0 : index
      %c0_23 = arith.constant 0 : index
      %32 = vector.load %arg13[%c0_22, %c0_23] : memref<1x128xf32, #tpu.memory_space<vmem>>, vector<1x128xf32>
      tpu.vector_store %arg13[%c0_22, %c0_23], %31 {strides = array<i32>} : memref<1x128xf32, #tpu.memory_space<vmem>>, vector<1x128xf32>,
    } else {
    }
    %c1_i32 = arith.constant 1 : i32
    %19 = arith.cmpi eq, %arg0, %c1_i32 : i32
    %20 = arith.extui %19 : i1 to i32
    %c0_i32_13 = arith.constant 0 : i32
    %21 = arith.cmpi ne, %20, %c0_i32_13 : i32
    scf.if %21 {
      %c0_i32_14 = arith.constant 0 : i32
      %22 = arith.cmpi eq, %arg1, %c0_i32_14 : i32
      %c0_i32_15 = arith.constant 0 : i32
      %23 = arith.cmpi eq, %arg2, %c0_i32_15 : i32
      %24 = arith.andi %22, %23 : i1
      %25 = arith.extui %24 : i1 to i32
      %c0_i32_16 = arith.constant 0 : i32
      %26 = arith.cmpi ne, %25, %c0_i32_16 : i32
      scf.if %26 {
        %c0_32 = arith.constant 0 : index
        %c0_33 = arith.constant 0 : index
        %53 = vector.load %arg12[%c0_32, %c0_33] : memref<1x128xf32, #tpu.memory_space<vmem>>, vector<1x128xf32>
        %cst_34 = arith.constant 6.250000e-02 : f32
        %54 = vector.broadcast %cst_34 : f32 to vector<1x128xf32>
        %55 = arith.mulf %53, %54 : vector<1x128xf32>
        %c0_35 = arith.constant 0 : index
        %c0_36 = arith.constant 0 : index
        %56 = vector.load %arg13[%c0_35, %c0_36] : memref<1x128xf32, #tpu.memory_space<vmem>>, vector<1x128xf32>
        %cst_37 = arith.constant 6.250000e-02 : f32
        %57 = vector.broadcast %cst_37 : f32 to vector<1x128xf32>
        %58 = arith.mulf %56, %57 : vector<1x128xf32>
        %59 = arith.mulf %55, %55 : vector<1x128xf32>
        %60 = arith.subf %58, %59 : vector<1x128xf32>
        %cst_38 = arith.constant 0.000000e+00 : f32
        %61 = vector.broadcast %cst_38 : f32 to vector<1x128xf32>
        %62 = arith.maximumf %60, %61 : vector<1x128xf32>
        %c0_39 = arith.constant 0 : index
        %c0_40 = arith.constant 0 : index
        %63 = vector.load %arg7[%c0_39, %c0_40] : memref<1x128xf32, #tpu.memory_space<vmem>>, vector<1x128xf32>
        %cst_41 = arith.constant 9.99999993E-9 : f32
        %64 = vector.broadcast %cst_41 : f32 to vector<1x128xf32>
        %65 = arith.addf %62, %64 : vector<1x128xf32>
        %66 = math.rsqrt %65 : vector<1x128xf32>
        %67 = arith.mulf %63, %66 : vector<1x128xf32>
        %c0_42 = arith.constant 0 : index
        %c0_43 = arith.constant 0 : index
        %68 = vector.load %arg8[%c0_42, %c0_43] : memref<1x128xf32, #tpu.memory_space<vmem>>, vector<1x128xf32>
        %69 = arith.mulf %55, %67 : vector<1x128xf32>
        %70 = arith.subf %68, %69 : vector<1x128xf32>
        %c0_44 = arith.constant 0 : index
        %c0_45 = arith.constant 0 : index
        %71 = vector.load %arg12[%c0_44, %c0_45] : memref<1x128xf32, #tpu.memory_space<vmem>>, vector<1x128xf32>
        tpu.vector_store %arg12[%c0_44, %c0_45], %67 {strides = array<i32>} : memref<1x128xf32, #tpu.memory_space<vmem>>, vector<1x128xf32>,
        %c0_46 = arith.constant 0 : index
        %c0_47 = arith.constant 0 : index
        %72 = vector.load %arg13[%c0_46, %c0_47] : memref<1x128xf32, #tpu.memory_space<vmem>>, vector<1x128xf32>
        tpu.vector_store %arg13[%c0_46, %c0_47], %70 {strides = array<i32>} : memref<1x128xf32, #tpu.memory_space<vmem>>, vector<1x128xf32>,
      } else {
      }
      %c0_17 = arith.constant 0 : index
      %c0_18 = arith.constant 0 : index
      %27 = vector.load %arg12[%c0_17, %c0_18] : memref<1x128xf32, #tpu.memory_space<vmem>>, vector<1x128xf32>
      %28 = vector.broadcast %27 : vector<1x128xf32> to vector<8x128xf32>
      %29 = arith.mulf %8, %28 : vector<8x128xf32>
      %c0_19 = arith.constant 0 : index
      %c0_20 = arith.constant 0 : index
      %30 = vector.load %arg13[%c0_19, %c0_20] : memref<1x128xf32, #tpu.memory_space<vmem>>, vector<1x128xf32>
      %31 = vector.broadcast %30 : vector<1x128xf32> to vector<8x128xf32>
      %32 = arith.addf %29, %31 : vector<8x128xf32>
      %33 = arith.negf %32 : vector<8x128xf32>
      %34 = math.exp %33 : vector<8x128xf32>
      %cst_21 = arith.constant 1.000000e+00 : f32
      %35 = vector.broadcast %cst_21 : f32 to vector<8x128xf32>
      %36 = arith.addf %35, %34 : vector<8x128xf32>
      %37 = arith.divf %35, %36 : vector<8x128xf32>
      %c0_22 = arith.constant 0 : index
      %c0_23 = arith.constant 0 : index
      %38 = vector.load %arg6[%c0_22, %c0_23] : memref<1x128xf32, #tpu.memory_space<vmem>>, vector<1x128xf32>
      %cst_24 = arith.constant 1.000000e+00 : f32
      %39 = vector.broadcast %cst_24 : f32 to vector<8x128xf32>
      %40 = arith.subf %39, %37 : vector<8x128xf32>
      %41 = vector.broadcast %38 : vector<1x128xf32> to vector<8x128xf32>
      %42 = arith.mulf %41, %40 : vector<8x128xf32>
      %43 = arith.addf %42, %37 : vector<8x128xf32>
      %44 = arith.mulf %43, %8 : vector<8x128xf32>
      %c0_25 = arith.constant 0 : index
      %c0_26 = arith.constant 0 : index
      %45 = vector.load %arg9[%c0_25, %c0_26] : memref<1x128xf32, #tpu.memory_space<vmem>>, vector<1x128xf32>
      %cst_27 = arith.constant dense<0.000000e+00> : vector<1x8xf32>
      %46 = tpu.matmul %45, %44, %cst_27 {dimension_numbers = #tpu.dot_dimension_numbers<[1], [1], [0], [0], [0, 0, 1, 0], [], []>} : vector<1x128xf32>, vector<8x128xf32>, vector<1x8xf32> -> vector<1x8xf32>
      %c0_28 = arith.constant 0 : index
      %c0_29 = arith.constant 0 : index
      %47 = memref.load %arg10[%c0_28, %c0_29] : memref<1x1xf32, #tpu.memory_space<smem>>
      %48 = vector.broadcast %47 : f32 to vector<1x8xf32>
      %49 = arith.addf %46, %48 : vector<1x8xf32>
      %50 = vector.shape_cast %49 : vector<1x8xf32> to vector<1x1x8xf32>
      %c0_30 = arith.constant 0 : index
      %51 = arith.index_cast %arg2 : i32 to index
      %c0_31 = arith.constant 0 : index
      %52 = vector.load %arg11[%c0_30, %51, %c0_31] : memref<1x1x8xf32, #tpu.memory_space<vmem>>, vector<1x1x8xf32>
      tpu.vector_store %arg11[%c0_30, %51, %c0_31], %50 {strides = array<i32>} : memref<1x1x8xf32, #tpu.memory_space<vmem>>, vector<1x1x8xf32>,
    } else {
    }
    return
  }
  func.func @transform_0(%arg0: i32, %arg1: i32, %arg2: i32) -> (i32, i32, i32) {
    %c0_i32 = arith.constant 0 : i32
    %c0_i32_0 = arith.constant 0 : i32
    return %arg1, %arg2, %c0_i32 : i32, i32, i32
  }
  func.func @transform_1(%arg0: i32, %arg1: i32, %arg2: i32) -> (i32, i32, i32) {
    %c0_i32 = arith.constant 0 : i32
    %c0_i32_0 = arith.constant 0 : i32
    %c0_i32_1 = arith.constant 0 : i32
    return %arg1, %c0_i32, %c0_i32_0 : i32, i32, i32
  }
  func.func @transform_2(%arg0: i32, %arg1: i32, %arg2: i32) -> (i32, i32, i32) {
    %c0_i32 = arith.constant 0 : i32
    %c0_i32_0 = arith.constant 0 : i32
    %c0_i32_1 = arith.constant 0 : i32
    return %arg1, %c0_i32, %c0_i32_0 : i32, i32, i32
  }
  func.func @transform_3(%arg0: i32, %arg1: i32, %arg2: i32) -> (i32, i32) {
    %c0_i32 = arith.constant 0 : i32
    %c0_i32_0 = arith.constant 0 : i32
    %c0_i32_1 = arith.constant 0 : i32
    return %c0_i32, %c0_i32_0 : i32, i32
  }
  func.func @transform_4(%arg0: i32, %arg1: i32, %arg2: i32) -> (i32, i32) {
    %c0_i32 = arith.constant 0 : i32
    %c0_i32_0 = arith.constant 0 : i32
    %c0_i32_1 = arith.constant 0 : i32
    return %c0_i32, %c0_i32_0 : i32, i32
  }
  func.func @transform_5(%arg0: i32, %arg1: i32, %arg2: i32) -> (i32, i32) {
    %c0_i32 = arith.constant 0 : i32
    %c0_i32_0 = arith.constant 0 : i32
    %c0_i32_1 = arith.constant 0 : i32
    return %c0_i32, %c0_i32_0 : i32, i32
  }
  func.func @transform_6(%arg0: i32, %arg1: i32, %arg2: i32) -> (i32, i32) {
    %c0_i32 = arith.constant 0 : i32
    %c0_i32_0 = arith.constant 0 : i32
    %c0_i32_1 = arith.constant 0 : i32
    return %c0_i32, %c0_i32_0 : i32, i32
  }
  func.func @transform_7(%arg0: i32, %arg1: i32, %arg2: i32) -> (i32, i32) {
    %c0_i32 = arith.constant 0 : i32
    %c0_i32_0 = arith.constant 0 : i32
    %c0_i32_1 = arith.constant 0 : i32
    return %c0_i32, %c0_i32_0 : i32, i32
  }
  func.func @transform_8(%arg0: i32, %arg1: i32, %arg2: i32) -> (i32, i32, i32) {
    %c0_i32 = arith.constant 0 : i32
    %c0_i32_0 = arith.constant 0 : i32
    %c0_i32_1 = arith.constant 0 : i32
    return %arg1, %c0_i32, %c0_i32_0 : i32, i32, i32
  }
}

</mosaic_0001>

<bundles_post_ra>
// kernel: tpu_custom_call.1
= control target key start
LH: loop header
LB: loop body
LE: loop exit
PB: predicated region body
PF: predicated region fallthrough
CT: control target
= control target key end

     0   :  { %s1149_s0 = inlined_call_operand.vmem [shape: f32[2,8,4], index: 0, kind: input, shape index: {}]   ;;  %s1150_s1 = inlined_call_operand.vmem [shape: f32[2,1,128], index: 1, kind: input, shape index: {}]   ;;  %s1151_s2 = inlined_call_operand.vmem [shape: f32[2,4,128], index: 2, kind: input, shape index: {}]   ;;  %s1152_s3 = inlined_call_operand.vmem [shape: f32[1,128], index: 3, kind: input, shape index: {}]   ;;  %s1153_s4 = inlined_call_operand.vmem [shape: f32[1,128], index: 4, kind: input, shape index: {}]   ;;  %s1154_s5 = inlined_call_operand.vmem [shape: f32[1,128], index: 5, kind: input, shape index: {}]   ;;  %s1155_s6 = inlined_call_operand.vmem [shape: f32[1,128], index: 6, kind: input, shape index: {}]   ;;  %s1156_s7 = inlined_call_operand.<no memory space> [shape: f32[1,1], index: 7, kind: input, shape index: {}]   ;;  %s1157_s8 = inlined_call_operand.hbm [shape: f32[2,1,8], index: 8, kind: output, shape index: {}]  }
   0x1   :  { %13 = sst [smem:[#allocation4]] %s1156_s7 }
   0x2   :  { %14 = vsyncpa [#allocation6], 0 }
   0x3   :  { %16 = vsyncpa [#allocation6 + $0x1], 0  ;;  %s988_s29 = smov 0   ;;  %s990_s30 = smov 0  }
   0x4   :  { %s992_s9 = smov 0   ;;  %s994_s10 = smov 0  }
   0x5   :  { %s996_s11 = smov 0   ;;  %s998_s12 = smov 0  }
   0x6   :  { %s1000_s13 = smov 0   ;;  %s1002_s14 = smov 0  }
   0x7 LB: > { %s722_s7 = sadd.s32 4294967295, %s932_s14   ;;  %s723_s15 = sadd.s32 4294967294, %s932_s14   ;;  %s932_s14 = sphi %s1002_s14, %s22_s14   ;;  %s928_s13 = sphi %s1000_s13, %s1173_s13   ;;  %s924_s12 = sphi %s998_s12, %s1172_s12   ;;  %s920_s11 = sphi %s996_s11, %s1171_s11   ;;  %s916_s10 = sphi %s994_s10, %s1170_s10   ;;  %s912_s9 = sphi %s992_s9, %s1169_s9   ;;  %s908_s30 = sphi %s990_s30, %s1168_s30   ;;  %s904_s29 = sphi %s988_s29, %s1167_s29  }
   0x8   : > { %s37_s16 = sadd.s32 1, %s924_s12  ;;  %s41_s17 = sadd.s32 1, %s928_s13 }
   0x9   : > { %p39_p0 = scmp.ge.s32.totalorder %s37_s16, 2  ;;  %s233_s18 = sadd.s32 1, %s912_s9 }
   0xa   : > { %p243_p1 = scmp.ne.s32.totalorder %s912_s9, %s908_s30  ;;  %p244_p2 = scmp.eq.s32.totalorder %s722_s7, 3 }
   0xb   : > { %s1175_s16 = smov (%p39_p0, %s37_s16), 0  ;;  %s1177_s17 = smov (!%p39_p0, %s41_s17), %s928_s13 }
   0xc   : > { %1159 = sst [smem:[#allocation8_spill]] %s1175_s16  ;;  %s230_s19 = ssub.s32 %s924_s12, %s1175_s16 }
   0xd   : > { %p1040_p3 = por %p244_p2, %p243_p1  ;;  %p43_p4 = scmp.ge.s32.totalorder %s1177_s17, 2 }
   0xe   : > { %p231_p5 = scmp.eq.s32.totalorder %s230_s19, 0  ;;  %p249_p6 = scmp.ne.s32.totalorder %s908_s30, %s904_s29 }
   0xf   : > { %p250_p7 = scmp.eq.s32.totalorder %s723_s15, 3  ;;  %s1179_s17 = smov (%p43_p4, %s1177_s17), 0 }
  0x10   : > { %1161 = sst [smem:[#allocation9_spill]] %s1179_s17  ;;  %p726_p9 = scmp.ge.s32.totalorder %s932_s14, 1 }
  0x11   : > { %s1049_s21 = scalar_select %p231_p5, %s912_s9, %s233_s18  }
  0x12   : > { %p1051_p8 = por %p250_p7, %p249_p6  ;;  %p306_p10 = scmp.lt.s32.totalorder %s932_s14, 5 }
  0x14   : > { %p307_p11 = pnand %p726_p9, %p306_p10 }
  0x15   : > { %p348_p12 = scmp.lt.s32.totalorder (!%p307_p11), %s916_s10, 1  ;;  %p449_p13 = scmp.eq.s32.totalorder (!%p307_p11), %s920_s11, 0 }
  0x16   : > { %310 = sbr.rel (%p307_p11) target bundleno = 565 (0x235), region = 52  ;;  %p450_p0 = scmp.eq.s32.totalorder (!%p307_p11), %s916_s10, 0 }
  0x18   : > { %p451_p1 = pnand (!%p307_p11), %p450_p0, %p449_p13 }
  0x1b   : > { %v934_v0 = vmov 0.0   ;;  %vm935_vm0 = vmmov 0   ;;  %s349_s24 = scalar_select %p348_p12, %s916_s10, 1  ;;  %vm375_vm1 = vcmask 1043456   ;;  %vm371_vm2 = vcmask 31744  }
  0x1c   : > { %748 = vmatprep.subr.mxu0 %v934_v0  ;;  %750 = vmatprep.mubr.msk.f32.mxu0 %vm935_vm0, %v934_v0 }
  0x1d   : > { %s728_s25 = sshll.u32 %s349_s24, 2  ;;  %s727_s26 = sshll.u32 %s349_s24, 3 }
  0x1e   : > { %s361_s7 = scalar_lea.vmem %s1151_s2, %s728_s25  ;;  %s354_s19 = scalar_lea.vmem %s1149_s0, %s727_s26 }
  0x1f   : > { %v363_v1 = vld [vmem:[%s361_s7] sm:$0xf]  ;;  %s357_s16 = scalar_lea.vmem %s1150_s1, %s349_s24  ;;  %s1163_s25 = sand.u32 1, %s908_s30  }
  0x20   : > { %v362_v2 = vld [vmem:[%s354_s19] sm:$0xff]  ;;  %749 = vmatpush3.msk.msra.mxu0 %vm375_vm1, %v363_v1  ;;  %s1077_s26 = scalar_lea.vmem [#allocation5], %s1163_s25 }
  0x21   : > { %751 = vmatmul.mubr.msk.f32.vlgmr.msra.gmra.mxu0 %vm371_vm2, %v362_v2  ;;  %v729_v3 = vld [vmem:[%s357_s16] ss:$0 sm:$0xff] }
  0xdf   : > { %457 = sbr.rel (%p451_p1) target bundleno = 230 (0xe6), region = 56 }
  0xe1   : > { %v445_v4 = vpop.f32.mrf.mxu0 }
  0xe2   : > { %v1073_v5 = vadd.f32 %v729_v3, %v445_v4 }
  0xe3   : > { %v752_v6 = vpop.f32.mrf.mxu0 }
  0xe4   : > { %v936_v7 = vmov 0.0  }
  0xe5   : > { %458 = vst [vmem:[#allocation2] sm:$0x1] %v936_v7  ;;  %459 = vst [vmem:[#allocation3] sm:$0x1] %v936_v7 }
  0xe6 PF: > { %p733_p2 = scmp.ne.s32.totalorder %s920_s11, 0 }
  0xe8   : > { %462 = sbr.rel (%p733_p2) target bundleno = 254 (0xfe), region = 60 }
  0xed   : > { %v464_v8 = vrot.slane %v1073_v5, 4  ;;  %v473_v9 = vmul.f32 %v1073_v5, %v1073_v5  ;;  %v463_v18 = vld [vmem:[#allocation2] sm:$0x1]  ;;  %v472_v21 = vld [vmem:[#allocation3] sm:$0x1] }
  0xef   : > { %v465_v10 = vadd.f32 %v464_v8, %v1073_v5  ;;  %v474_v11 = vrot.slane %v473_v9, 4 }
  0xf1   : > { %v466_v12 = vrot.slane %v465_v10, 2  ;;  %v475_v13 = vadd.f32 %v474_v11, %v473_v9 }
  0xf3   : > { %v467_v14 = vadd.f32 %v466_v12, %v465_v10  ;;  %v476_v15 = vrot.slane %v475_v13, 2 }
  0xf5   : > { %v468_v16 = vrot.slane %v467_v14, 1  ;;  %v477_v17 = vadd.f32 %v476_v15, %v475_v13 }
  0xf7   : > { %v469_v19 = vadd.f32 %v468_v16, %v467_v14  ;;  %v478_v20 = vrot.slane %v477_v17, 1 }
  0xf9   : > { %v470_v22 = vadd.f32 %v469_v19, %v463_v18  ;;  %v479_v23 = vadd.f32 %v478_v20, %v477_v17 }
  0xfb   : > { %471 = vst [vmem:[#allocation2] sm:$0x1] %v470_v22  ;;  %v480_v24 = vadd.f32 %v479_v23, %v472_v21 }
  0xfd   : > { %481 = vst [vmem:[#allocation3] sm:$0x1] %v480_v24 }
  0xfe PF: > { %p734_p4 = scmp.ne.s32.totalorder %s920_s11, 1 }
 0x100   : > { %485 = sbr.rel (%p734_p4) target bundleno = 541 (0x21d), region = 64 }
 0x105   : > { %489 = sbr.rel (!%p450_p0) target bundleno = 293 (0x125), region = 68  ;;  %v490_v25 = vld [vmem:[#allocation2] sm:$0x1] (%p450_p0)  ;;  %v492_v26 = vld [vmem:[#allocation3] sm:$0x1] (%p450_p0) }
 0x106   : > { %v491_v27 = vmul.f32 (%p450_p0), 0.0625, %v490_v25  ;;  %v493_v28 = vmul.f32 (%p450_p0), 0.0625, %v492_v26  ;;  %v497_v33 = vld [vmem:[%s1153_s4] sm:$0x1] (%p450_p0) }
 0x107   : > { %v501_v36 = vld [vmem:[%s1154_s5] sm:$0x1] (%p450_p0) }
 0x108   : > { %v494_v29 = vmul.f32 (%p450_p0), %v491_v27, %v491_v27 }
 0x10a   : > { %v495_v30 = vsub.f32 %v493_v28, %v494_v29 }
 0x10c   : > { %v496_v31 = vmax.f32 %v495_v30, 0.0 }
 0x10e   : > { %v498_v32 = vadd.f32 1e-08, %v496_v31 }
 0x110   : > { %834 = vrsqrt.f32 %v498_v32 }
 0x11d   : > { %v835_v34 = vpop.eup %834 }
 0x11e   : > { %v500_v35 = vmul.f32 %v835_v34, %v497_v33 }
 0x120   : > { %504 = vst [vmem:[#allocation2] sm:$0x1] %v500_v35  ;;  %v502_v37 = vmul.f32 %v500_v35, %v491_v27 }
 0x122   : > { %v503_v38 = vsub.f32 %v501_v36, %v502_v37 }
 0x124   : > { %505 = vst [vmem:[#allocation3] sm:$0x1] %v503_v38 }
 0x125 PF: > { %v937_v41 = vmov 0.0   ;;  %vm938_vm3 = vmmov 0   ;;  %v739_v48 = vld [vmem:[%s1152_s3] ss:$0 sm:$0xff]  ;;  %s540_s15 = sld [smem:[#allocation4]]  ;;  %vm613_vm4 = vcmask 57344  }
 0x126   : > { %753 = vmatprep.subr.mxu0 %v937_v41  ;;  %755 = vmatprep.mubr.msk.f32.mxu0 %vm938_vm3, %v937_v41  ;;  %v539_v53 = vld [vmem:[%s1155_s6] sm:$0x1] }
 0x127   : > { %v736_v39 = vld [vmem:[#allocation2] ss:$0 sm:$0xff] }
 0x128   : > { %v513_v42 = vmul.f32 %v736_v39, %v1073_v5 }
 0x12b   : > { %v737_v40 = vld [vmem:[#allocation3] ss:$0 sm:$0xff]  ;;  %v541_v54 = vstv %s540_s15 }
 0x12c   : > { %v521_v43 = vadd.f32 %v737_v40, %v513_v42 }
 0x12e   : > { %v738_v44 = vmul.f32 -1.442695, %v521_v43 }
 0x130   : > { %836 = vpow2.f32 %v738_v44 }
 0x13d   : > { %v837_v45 = vpop.eup %836 }
 0x13e   : > { %v525_v46 = vadd.f32 1.0, %v837_v45 }
 0x140   : > { %838 = vrcp.f32 %v525_v46 }
 0x14d   : > { %v839_v47 = vpop.eup %838 }
 0x14e   : > { %v529_v49 = vsub.f32 1.0, %v839_v47 }
 0x150   : > { %v536_v50 = vmul.f32 %v739_v48, %v529_v49 }
 0x152   : > { %v537_v51 = vadd.f32 %v839_v47, %v536_v50 }
 0x154   : > { %v538_v52 = vmul.f32 %v537_v51, %v1073_v5 }
 0x156   : > { %754 = vmatpush3.xpose.msra.mxu0 %v538_v52 }
 0x159   : > { %756 = vmatmul.mubr.f32.vlgmr.msra.gmra.mxu0 %v539_v53 }
 0x219   : > { %v608_v55 = vpop.f32.mrf.mxu0 }
 0x21a   : > { %v609_v56 = vadd.f32 %v608_v55, %v541_v54 }
 0x21b   : > { %v757_v57 = vpop.f32.mrf.mxu0 }
 0x21c   : > { %614 = vst.msk [vmem:[%s1077_s26] sm:$0x1] %vm613_vm4, %v609_v56 }
 0x21d PF: > { %s740_s18 = sshll.u32 %s916_s10, 4  ;;  %s628_s17 = sshll.u32 %s1077_s26, 4  ;;  %s629_s17 = int_to_ptr.vmem [resolvable:$true] %s628_s17 }
 0x21e   : > { %s626_s16 = scalar_lea.hbm %s1157_s8, %s740_s18  ;;  %s1164_s11 = sand.u32 1, %s908_s30  }
 0x21f   : > { %s616_s23 = scalar_lea.sflag [#allocation6], %s1164_s11  ;;  %s840_s24 = scalar_lea.vmem %s629_s17, 16 }
 0x220   : > { %p841_p5 = scmp.ne.s32.totalorder %s629_s17, %s840_s24  ;;  %s939_s27 = smov [#allocation5]  }
 0x221   : > { %s844_s28 = sshll.u32 %s939_s27, 4  ;;  %s845_s28 = int_to_ptr.vmem [resolvable:$false] %s844_s28 }
 0x222   : > { %p842_p6 = pnand %p841_p5, %p1040_p3  ;;  %s846_s7 = scalar_lea.vmem %s845_s28, 32 }
 0x223   : > { %p847_p9 = scmp.lt.s32.totalorder %s629_s17, %s845_s28  ;;  %p848_p10 = scmp.lt.s32.totalorder %s846_s7, %s840_s24 }
 0x224   : > { %p843_p7 = pneg %p842_p6 }
 0x225   : > { %p849_p11 = por %p848_p10, %p847_p9 }
 0x227   : > { %p850_p12 = pnand %p849_p11, %p843_p7 }
 0x229   : > { %853 = shalt.err (!%p850_p12)
}
 0x22a   : > { %s854_s10 = scalar_lea.hbm %s626_s16, 16  ;;  %s858_s18 = scalar_lea.hbm %s1157_s8, 32 }
 0x22b   : > { %p855_p13 = scmp.ne.s32.totalorder %s626_s16, %s854_s10  ;;  %p859_p2 = scmp.lt.s32.totalorder %s626_s16, %s1157_s8 }
 0x22c   : > { %p860_p4 = scmp.lt.s32.totalorder %s858_s18, %s854_s10 }
 0x22d   : > { %p856_p0 = pnand %p855_p13, %p1040_p3 }
 0x22e   : > { %p861_p5 = por %p860_p4, %p859_p2 }
 0x22f   : > { %p857_p1 = pneg %p856_p0 }
 0x231   : > { %p862_p6 = pnand %p861_p5, %p857_p1 }
 0x233   : > { %865 = shalt.err (!%p862_p6)
}
 0x234   : > { %758 = dma.vmem_to_hbm [thread:$0]  (%p1040_p3), %s629_s17, 16, %s626_s16, %s616_s23  }
 0x235 PF: > { %p764_p7 = scmp.ge.s32.totalorder %s932_s14, 2  ;;  %s640_s11 = sand.u32 1, %s904_s29  }
 0x236   : > { %s641_s24 = scalar_lea.sflag [#allocation6], %s640_s11 }
 0x237   : > { %p761_p9 = pnand %p764_p7, %p1051_p8 }
 0x239   : > { %p762_p10 = pneg %p761_p9 }
 0x23b   : > { %899 = dma.done.wait (%p762_p10), %s641_s24, 16  }
 0x23c   : > { %901 = vsyncadd (%p762_p10), %s641_s24, 4294967280  ;;  %s22_s14 = sadd.s32 1, %s932_s14   ;;  %s1165_s20 = sld [smem:[#allocation8_spill]] }
 0x23d   : > { %p19_p11 = scmp.ge.s32.totalorder %s22_s14, 6   ;;  %s1166_s16 = sld [smem:[#allocation9_spill]] }
 0x23e   : > { %s1167_s29 = smov %s908_s30  ;;  %s1168_s30 = smov %s912_s9 }
 0x23f   : > { %s1169_s9 = smov %s1049_s21  ;;  %s1170_s10 = smov %s924_s12 }
 0x240   : > { %s1171_s11 = smov %s928_s13  ;;  %21 = sbr.rel (!%p19_p11) target bundleno = 7 (0x7), region = 110 }
 0x242   : > { %s1172_s12 = smov %s1165_s20 }
 0x243   : > { %s1173_s13 = smov %s1166_s16 }
 0x245   :  { %645 = vsyncpa [#allocation6], 1 }
 0x246   :  { %647 = vsyncpa [#allocation6 + $0x1], 1 }

</bundles_post_ra>
